<compile_context>
chip_gen: v7x
topology: tpu7x:2x2x1
jax: 0.10.0
libtpu: 0.0.40
codegen_flags: <defaults>
</compile_context>

<pallas_src>
import jax
import jax.numpy as jnp
from jax.experimental import pallas as pl
from jax.experimental.pallas import tpu as pltpu


def _round_up(x, m):
    return (x + m - 1) // m * m


def mlp_kernel(x_ref, w1_ref, b1_ref, w2_ref, b2_ref, w3_ref, b3_ref, o_ref):
    # x_ref: (7, TN) bf16 (batch on lanes); weights bf16 in torch (out, in) layout;
    # biases f32 as (out, 1) columns (broadcast across lanes).
    xT = x_ref[...]                                                      # (7, TN) bf16

    h1 = jnp.dot(w1_ref[...], xT, preferred_element_type=jnp.float32)    # (30, TN) f32
    h1 = jnp.tanh(h1 + b1_ref[...])                                      # f32 -> EUP

    h2 = jnp.dot(w2_ref[...], h1.astype(jnp.bfloat16),
                 preferred_element_type=jnp.float32)                     # (30, TN) f32
    h2 = jax.nn.sigmoid(h2 + b2_ref[...])                                # logistic -> EUP

    out = jnp.dot(w3_ref[...], h2.astype(jnp.bfloat16),
                  preferred_element_type=jnp.float32) + b3_ref[...]      # (1, TN) f32
    o_ref[...] = out.astype(o_ref.dtype)                                 # lane-dense store


def neural_network_forward(x, params, *, tn=2048):
    """x: (B, ...) flattened to (B, 7); params in torch layout (w: (out,in), b: (out,)).
    Returns logits of shape (B, 1) in float32."""
    B = x.shape[0]
    x2d = x.reshape(B, -1).astype(jnp.float32)           # nn.Flatten()
    assert x2d.shape[1] == 7, f"expected 7 features after flatten, got {x2d.shape[1]}"
    w1, b1, w2, b2, w3, b3 = params

    # Lane tile: multiple of 128, capped at `tn` (1K-8K is the sweet spot; tiny
    # demo batches collapse to one tile).  Pad batch to a multiple of the tile.
    TN = min(tn, _round_up(B, 128))
    B_pad = _round_up(B, TN)
    n_tiles = B_pad // TN

    # Transposed, zero-padded input: (7, B_pad), bf16 for the MXU.
    xT = jnp.pad(x2d, ((0, B_pad - B), (0, 0))).T.astype(jnp.bfloat16)

    w1b, w2b, w3b = (w.astype(jnp.bfloat16) for w in (w1, w2, w3))
    b1c, b2c, b3c = (b.reshape(-1, 1).astype(jnp.float32) for b in (b1, b2, b3))

    const = lambda i: (0, 0)   # weights/biases: single block, resident across the grid
    outT = pl.pallas_call(
        mlp_kernel,
        out_shape=jax.ShapeDtypeStruct((1, B_pad), jnp.float32),
        grid_spec=pltpu.PrefetchScalarGridSpec(
            num_scalar_prefetch=0,
            grid=(n_tiles,),
            in_specs=[
                pl.BlockSpec((7, TN), lambda i: (0, i)),   # x tile: batch on lanes
                pl.BlockSpec((30, 7), const),
                pl.BlockSpec((30, 1), const),
                pl.BlockSpec((30, 30), const),
                pl.BlockSpec((30, 1), const),
                pl.BlockSpec((1, 30), const),
                pl.BlockSpec((1, 1), const),
            ],
            out_specs=pl.BlockSpec((1, TN), lambda i: (0, i)),
        ),
        compiler_params=pltpu.CompilerParams(
            dimension_semantics=("parallel",),   # megacore sharding on v7x; no-op on v5e/v6e
        ),
    )(xT, w1b, b1c, w2b, b2c, w3b, b3c)

    return outT[0, :B].reshape(B, 1)


def init_params(key):
    """Torch nn.Linear-style init: w (out,in), b (out,), U[-1/sqrt(fan_in), 1/sqrt(fan_in)]."""
    def linear(key, fan_in, fan_out):
        kw, kb = jax.random.split(key)
        bound = 1.0 / jnp.sqrt(jnp.float32(fan_in))
        w = jax.random.uniform(kw, (fan_out, fan_in), jnp.float32, -bound, bound)
        b = jax.random.uniform(kb, (fan_out,), jnp.float32, -bound, bound)
        return w, b

    k1, k2, k3 = jax.random.split(key, 3)
    w1, b1 = linear(k1, 7, 30)
    w2, b2 = linear(k2, 30, 30)
    w3, b3 = linear(k3, 30, 1)
    return (w1, b1, w2, b2, w3, b3)


if __name__ == "__main__":
    key = jax.random.PRNGKey(0)
    kp, kx = jax.random.split(key)
    params = init_params(kp)

    # Small demo batch, deliberately not a multiple of 128 to exercise ragged padding.
    B = 300
    x = jax.random.normal(kx, (B, 7), jnp.float32)

    out = jax.block_until_ready(neural_network_forward(x, params))

    # Plain-JAX f32 reference (torch-layout weights). bf16 MXU operands => loose tolerance.
    w1, b1, w2, b2, w3, b3 = params
    h1 = jnp.tanh(x @ w1.T + b1)
    h2 = jax.nn.sigmoid(h1 @ w2.T + b2)
    ref = h2 @ w3.T + b3

    assert out.shape == (B, 1)
    assert jnp.allclose(out, ref, atol=5e-2, rtol=5e-2), float(jnp.max(jnp.abs(out - ref)))
    print("KERNEL_OK")
</pallas_src>

<mosaic_0001>
module attributes {stable_mosaic.version = 11 : i64} {
  func.func @mlp_kernel(%arg0: i32, %arg1: memref<7x384xbf16, #tpu.memory_space<vmem>>, %arg2: memref<30x7xbf16, #tpu.memory_space<vmem>>, %arg3: memref<30x1xf32, #tpu.memory_space<vmem>>, %arg4: memref<30x30xbf16, #tpu.memory_space<vmem>>, %arg5: memref<30x1xf32, #tpu.memory_space<vmem>>, %arg6: memref<1x30xbf16, #tpu.memory_space<vmem>>, %arg7: memref<1x1xf32, #tpu.memory_space<vmem>>, %arg8: memref<1x384xf32, #tpu.memory_space<vmem>>) attributes {dimension_semantics = [#tpu.dimension_semantics<parallel>], iteration_bounds = array<i64: 1>, scalar_prefetch = 0 : i64, scratch_operands = 0 : i64, tpu.core_type = #tpu.core_type<tc>, window_params = [{transform_indices = @transform_0, window_bounds = array<i64: 7, 384>}, {pipeline_mode = #tpu.pipeline_mode<synchronous>, transform_indices = @transform_1, window_bounds = array<i64: 30, 7>}, {pipeline_mode = #tpu.pipeline_mode<synchronous>, transform_indices = @transform_2, window_bounds = array<i64: 30, 1>}, {pipeline_mode = #tpu.pipeline_mode<synchronous>, transform_indices = @transform_3, window_bounds = array<i64: 30, 30>}, {pipeline_mode = #tpu.pipeline_mode<synchronous>, transform_indices = @transform_4, window_bounds = array<i64: 30, 1>}, {pipeline_mode = #tpu.pipeline_mode<synchronous>, transform_indices = @transform_5, window_bounds = array<i64: 1, 30>}, {pipeline_mode = #tpu.pipeline_mode<synchronous>, transform_indices = @transform_6, window_bounds = array<i64: 1, 1>}, {transform_indices = @transform_7, window_bounds = array<i64: 1, 384>}]} {
    %c0 = arith.constant 0 : index
    %c0_0 = arith.constant 0 : index
    %0 = vector.load %arg1[%c0, %c0_0] : memref<7x384xbf16, #tpu.memory_space<vmem>>, vector<7x384xbf16>
    %c0_1 = arith.constant 0 : index
    %c0_2 = arith.constant 0 : index
    %1 = vector.load %arg2[%c0_1, %c0_2] : memref<30x7xbf16, #tpu.memory_space<vmem>>, vector<30x7xbf16>
    %cst = arith.constant dense<0.000000e+00> : vector<30x384xf32>
    %2 = tpu.matmul %1, %0, %cst {dimension_numbers = #tpu.dot_dimension_numbers<[1], [0], [0], [1], [0, 0, 1, 1], [], []>} : vector<30x7xbf16>, vector<7x384xbf16>, vector<30x384xf32> -> vector<30x384xf32>
    %c0_3 = arith.constant 0 : index
    %c0_4 = arith.constant 0 : index
    %3 = vector.load %arg3[%c0_3, %c0_4] : memref<30x1xf32, #tpu.memory_space<vmem>>, vector<30x1xf32>
    %4 = vector.broadcast %3 : vector<30x1xf32> to vector<30x384xf32>
    %5 = arith.addf %2, %4 : vector<30x384xf32>
    %6 = math.tanh %5 : vector<30x384xf32>
    %c0_5 = arith.constant 0 : index
    %c0_6 = arith.constant 0 : index
    %7 = vector.load %arg4[%c0_5, %c0_6] : memref<30x30xbf16, #tpu.memory_space<vmem>>, vector<30x30xbf16>
    %8 = arith.truncf %6 : vector<30x384xf32> to vector<30x384xbf16>
    %cst_7 = arith.constant dense<0.000000e+00> : vector<30x384xf32>
    %9 = tpu.matmul %7, %8, %cst_7 {dimension_numbers = #tpu.dot_dimension_numbers<[1], [0], [0], [1], [0, 0, 1, 1], [], []>} : vector<30x30xbf16>, vector<30x384xbf16>, vector<30x384xf32> -> vector<30x384xf32>
    %c0_8 = arith.constant 0 : index
    %c0_9 = arith.constant 0 : index
    %10 = vector.load %arg5[%c0_8, %c0_9] : memref<30x1xf32, #tpu.memory_space<vmem>>, vector<30x1xf32>
    %11 = vector.broadcast %10 : vector<30x1xf32> to vector<30x384xf32>
    %12 = arith.addf %9, %11 : vector<30x384xf32>
    %13 = arith.negf %12 : vector<30x384xf32>
    %14 = math.exp %13 : vector<30x384xf32>
    %cst_10 = arith.constant 1.000000e+00 : f32
    %15 = vector.broadcast %cst_10 : f32 to vector<30x384xf32>
    %16 = arith.addf %15, %14 : vector<30x384xf32>
    %17 = arith.divf %15, %16 : vector<30x384xf32>
    %c0_11 = arith.constant 0 : index
    %c0_12 = arith.constant 0 : index
    %18 = vector.load %arg6[%c0_11, %c0_12] : memref<1x30xbf16, #tpu.memory_space<vmem>>, vector<1x30xbf16>
    %19 = arith.truncf %17 : vector<30x384xf32> to vector<30x384xbf16>
    %cst_13 = arith.constant dense<0.000000e+00> : vector<1x384xf32>
    %20 = tpu.matmul %18, %19, %cst_13 {dimension_numbers = #tpu.dot_dimension_numbers<[1], [0], [0], [1], [0, 0, 1, 1], [], []>} : vector<1x30xbf16>, vector<30x384xbf16>, vector<1x384xf32> -> vector<1x384xf32>
    %c0_14 = arith.constant 0 : index
    %c0_15 = arith.constant 0 : index
    %21 = vector.load %arg7[%c0_14, %c0_15] : memref<1x1xf32, #tpu.memory_space<vmem>>, vector<1x1xf32>
    %22 = vector.broadcast %21 : vector<1x1xf32> to vector<1x384xf32>
    %23 = arith.addf %20, %22 : vector<1x384xf32>
    %c0_16 = arith.constant 0 : index
    %c0_17 = arith.constant 0 : index
    %24 = vector.load %arg8[%c0_16, %c0_17] : memref<1x384xf32, #tpu.memory_space<vmem>>, vector<1x384xf32>
    tpu.vector_store %arg8[%c0_16, %c0_17], %23 {strides = array<i32>} : memref<1x384xf32, #tpu.memory_space<vmem>>, vector<1x384xf32>,
    return
  }
  func.func @transform_0(%arg0: i32) -> (i32, i32) {
    %c0_i32 = arith.constant 0 : i32
    %c0_i32_0 = arith.constant 0 : i32
    return %c0_i32, %arg0 : i32, i32
  }
  func.func @transform_1(%arg0: i32) -> (i32, i32) {
    %c0_i32 = arith.constant 0 : i32
    %c0_i32_0 = arith.constant 0 : i32
    %c0_i32_1 = arith.constant 0 : i32
    return %c0_i32, %c0_i32_0 : i32, i32
  }
  func.func @transform_2(%arg0: i32) -> (i32, i32) {
    %c0_i32 = arith.constant 0 : i32
    %c0_i32_0 = arith.constant 0 : i32
    %c0_i32_1 = arith.constant 0 : i32
    return %c0_i32, %c0_i32_0 : i32, i32
  }
  func.func @transform_3(%arg0: i32) -> (i32, i32) {
    %c0_i32 = arith.constant 0 : i32
    %c0_i32_0 = arith.constant 0 : i32
    %c0_i32_1 = arith.constant 0 : i32
    return %c0_i32, %c0_i32_0 : i32, i32
  }
  func.func @transform_4(%arg0: i32) -> (i32, i32) {
    %c0_i32 = arith.constant 0 : i32
    %c0_i32_0 = arith.constant 0 : i32
    %c0_i32_1 = arith.constant 0 : i32
    return %c0_i32, %c0_i32_0 : i32, i32
  }
  func.func @transform_5(%arg0: i32) -> (i32, i32) {
    %c0_i32 = arith.constant 0 : i32
    %c0_i32_0 = arith.constant 0 : i32
    %c0_i32_1 = arith.constant 0 : i32
    return %c0_i32, %c0_i32_0 : i32, i32
  }
  func.func @transform_6(%arg0: i32) -> (i32, i32) {
    %c0_i32 = arith.constant 0 : i32
    %c0_i32_0 = arith.constant 0 : i32
    %c0_i32_1 = arith.constant 0 : i32
    return %c0_i32, %c0_i32_0 : i32, i32
  }
  func.func @transform_7(%arg0: i32) -> (i32, i32) {
    %c0_i32 = arith.constant 0 : i32
    %c0_i32_0 = arith.constant 0 : i32
    return %c0_i32, %arg0 : i32, i32
  }
}

</mosaic_0001>

<bundles_post_ra>
// kernel: tpu_custom_call.1
= control target key start
LH: loop header
LB: loop body
LE: loop exit
PB: predicated region body
PF: predicated region fallthrough
CT: control target
= control target key end

     0   :  { %s915_s0 = inlined_call_operand.vmem [shape: bf16[7,384], index: 0, kind: input, shape index: {}]   ;;  %s916_s1 = inlined_call_operand.vmem [shape: bf16[30,7], index: 1, kind: input, shape index: {}]   ;;  %s917_s2 = inlined_call_operand.vmem [shape: f32[30,1], index: 2, kind: input, shape index: {}]   ;;  %s918_s3 = inlined_call_operand.vmem [shape: bf16[30,30], index: 3, kind: input, shape index: {}]   ;;  %s919_s4 = inlined_call_operand.vmem [shape: f32[30,1], index: 4, kind: input, shape index: {}]   ;;  %s920_s5 = inlined_call_operand.vmem [shape: bf16[1,30], index: 5, kind: input, shape index: {}]   ;;  %s921_s6 = inlined_call_operand.<no memory space> [shape: f32[1,1], index: 6, kind: input, shape index: {}]   ;;  %s922_s7 = inlined_call_operand.hbm [shape: f32[1,384], index: 7, kind: output, shape index: {}]  }
   0x1   :  { %v12_v0 = vstv %s921_s6 }
   0x2   :  { %13 = vst [vmem:[#allocation2] sm:$0x1] %v12_v0 }
   0x3   :  { %v30_v1 = vld [vmem:[%s915_s0] sm:$0xff]  ;;  %vm85_vm0 = vcmask 1042432   ;;  %vm86_vm1 = vcmask 1043456   ;;  %v778_v3 = vmov 65535   ;;  %v676_v5 = vld [vmem:[%s915_s0 + $0x8] ss:$0 sps:$4 sm:$0xff]  }
   0x4   :  { %v606_v2 = vcombine.high %v30_v1, %v30_v1  ;;  %v87_v4 = vsel %vm85_vm0, 4294967295, %v778_v3  ;;  %v605_v6 = vcombine.low %v30_v1, %v30_v1  ;;  %v779_v8 = vmov 0   ;;  %v678_v9 = vld [vmem:[%s916_s1] sm:$0xff]   ;;  %v37_v14 = vld [vmem:[%s917_s2 + $0x8] sm:$0xff]  ;;  %v38_v15 = vld [vmem:[%s917_s2 + $0x10] sm:$0xff] }
   0x5   :  { %v88_v7 = vsel %vm86_vm1, %v87_v4, 0  ;;  %130 = vmatprep.mubr.bf16.mxu0 %v779_v8  ;;  %vm78_vm2 = vcmask 56320   ;;  %673 = vset.pattern.permute.xlu0 %v779_v8  ;;  %v36_v10 = vld [vmem:[%s917_s2] sm:$0xff]  ;;  %v679_v16 = vld [vmem:[%s916_s1 + $0x8] sm:$0x7f]  }
   0x6   :  { %v93_v11 = vand.u32 %v606_v2, %v88_v7  ;;  %v96_v12 = vand.u32 %v676_v5, %v88_v7  ;;  %v90_v13 = vand.u32 %v605_v6, %v88_v7  ;;  %42 = vperm.xlu0 %673, %v36_v10   ;;  %674 = vset.pattern.permute.xlu1 %v779_v8  ;;  %v222_v17 = vld [vmem:[%s919_s4] sm:$0xff]  ;;  %v39_v18 = vld [vmem:[%s917_s2 + $0x18] sm:$0x3f] }
   0x7   :  { %646 = vmatprep.mubr.msk.bf16.mxu1 %vm78_vm2, %v678_v9  ;;  %52 = vperm.xlu1 %674, %v38_v15  }
   0x8   :  { %98 = vmatprep.subr.bf16.mxu0 %v93_v11  ;;  %644 = vmatprep.subr.bf16.mxu1 %v96_v12 }
   0x9   :  { %99 = vmatpush1.bf16.msra.mxu0 %v90_v13  ;;  %645 = vmatpush3.bf16.msra.mxu1 %v96_v12 }
   0xa   :  { %47 = vperm.xlu0 %673, %v37_v14  }
   0xb   :  { %14 = vsyncpa [#allocation4], 0  ;;  %57 = vperm.xlu1 %674, %v39_v18   ;;  %v224_v19 = vld [vmem:[%s919_s4 + $0x10] sm:$0xff]  ;;  %v223_v20 = vld [vmem:[%s919_s4 + $0x8] sm:$0xff]  ;;  %vm256_vm3 = vcmask 244736   ;;  %vm263_vm4 = vcmask 1046528  }
   0xc   :  { %608 = vmatmul.mubr.msk.bf16.vlgmr.msra.gmra.mrb[0].mxu0 %vm78_vm2, %v678_v9  ;;  %647 = vmatmul.mubr.msk.bf16.vlgmr.msra.gmra.mrb[0].mxu1 %vm78_vm2, %v679_v16  ;;  %v454_v21 = vld [vmem:[#allocation2] sm:$0x1]  ;;  %v225_v22 = vld [vmem:[%s919_s4 + $0x18] sm:$0x3f]  ;;  %v681_v9 = vld [vmem:[%s918_s3 + $0x8] sm:$0x7f]  }
   0xd   :  { %140 = vmatprep.mubr.bf16.mxu0 %v779_v8  ;;  %305 = vmatprep.mubr.bf16.mxu1 %v779_v8  ;;  %v875_v23 = vld [vmem:[%s918_s3] sm:$0xff]   ;;  %v780_v10 = vmov 0.0   ;;  %vm781_vm5 = vmmov 0  }
   0xe   :  { %228 = vperm.xlu0 %673, %v222_v17  }
   0xf   :  { %233 = vperm.xlu1 %674, %v223_v20  }
  0x12   :  { %238 = vperm.xlu0 %673, %v224_v19  }
  0x13   :  { %243 = vperm.xlu1 %674, %v225_v22  }
  0x14   :  { %609 = vmatmul.mubr.msk.bf16.gmra.mrb[4].mxu0 %vm78_vm2, %v679_v16 }
  0x15   :  { %654 = vmatprep.mubr.msk.bf16.mxu0 %vm256_vm3, %v875_v23 }
  0x16   :  { %457 = vperm.xlu0 %673, %v454_v21  }
  0x85   :  { %v43_v24 = vpop.permute.xlu0 %42 }
  0x86   :  { %v53_v25 = vpop.permute.xlu1 %52 }
  0x89   :  { %v48_v26 = vpop.permute.xlu0 %47 }
  0x8a   :  { %v58_v27 = vpop.permute.xlu1 %57 }
  0x8d   :  { %v229_v11 = vpop.permute.xlu0 %228 }
  0x8e   :  { %v234_v12 = vpop.permute.xlu1 %233 }
  0x91   :  { %v239_v13 = vpop.permute.xlu0 %238 }
  0x92   :  { %v244_v14 = vpop.permute.xlu1 %243 }
  0xdf   :  { %v132_v28 = vpop.f32.mrb[0].mxu0  ;;  %v648_v29 = vpop.f32.mrb[0].mxu1 }
  0xe0   :  { %v133_v30 = vadd.f32 %v132_v28, %v43_v24  ;;  %v194_v31 = vadd.f32 %v648_v29, %v53_v25  ;;  %v134_v32 = vpop.f32.mrb[1].mxu0  ;;  %v185_v33 = vpop.f32.mrb[1].mxu1 }
  0xe1   :  { %v135_v34 = vadd.f32 %v134_v32, %v43_v24  ;;  %v186_v35 = vadd.f32 %v185_v33, %v43_v24  ;;  %v136_v36 = vpop.f32.mrb[2].mxu0  ;;  %v649_v37 = vpop.f32.mrb[2].mxu1 }
  0xe2   :  { %682 = vtanh.f32 %v133_v30  ;;  %v137_v38 = vadd.f32 %v136_v36, %v48_v26  ;;  %v138_v39 = vpop.f32.mrb[3].mxu0  ;;  %v188_v40 = vpop.f32.mrb[3].mxu1  ;;  %v197_v41 = vadd.f32 %v649_v37, %v58_v27 }
  0xe3   :  { %684 = vtanh.f32 %v194_v31  ;;  %v139_v42 = vadd.f32 %v138_v39, %v48_v26  ;;  %v189_v43 = vadd.f32 %v188_v40, %v48_v26 }
  0xe4   :  { %686 = vtanh.f32 %v135_v34 }
  0xe5   :  { %688 = vtanh.f32 %v186_v35 }
  0xe6   :  { %690 = vtanh.f32 %v137_v38 }
  0xe7   :  { %692 = vtanh.f32 %v197_v41  ;;  %v142_v44 = vpop.f32.mrb[4].mxu0 }
  0xe8   :  { %694 = vtanh.f32 %v139_v42  ;;  %v143_v45 = vadd.f32 %v142_v44, %v53_v25  ;;  %v144_v46 = vpop.f32.mrb[5].mxu0 }
  0xe9   :  { %696 = vtanh.f32 %v189_v43  ;;  %v145_v47 = vadd.f32 %v144_v46, %v53_v25  ;;  %v146_v48 = vpop.f32.mrb[6].mxu0 }
  0xea   :  { %698 = vtanh.f32 %v143_v45  ;;  %v147_v49 = vadd.f32 %v146_v48, %v58_v27  ;;  %v148_v50 = vpop.f32.mrb[7].mxu0 }
  0xeb   :  { %700 = vtanh.f32 %v145_v47  ;;  %v149_v51 = vadd.f32 %v148_v50, %v58_v27 }
  0xec   :  { %v683_v52 = vpop.eup %682  ;;  %702 = vtanh.f32 %v147_v49 }
  0xed   :  { %v685_v53 = vpop.eup %684  ;;  %704 = vtanh.f32 %v149_v51 }
  0xee   :  { %v687_v54 = vpop.eup %686 }
  0xef   :  { %v689_v55 = vpop.eup %688 }
  0xf0   :  { %v691_v56 = vpop.eup %690 }
  0xf1   :  { %v693_v57 = vpop.eup %692  ;;  %v216_v58 = vpack.c.bf16 %v691_v56, %v683_v52 }
  0xf2   :  { %v695_v59 = vpop.eup %694  ;;  %v221_v60 = vpack.c.bf16 %v693_v57, %v685_v53 }
  0xf3   :  { %v697_v61 = vpop.eup %696  ;;  %v217_v62 = vpack.c.bf16 %v695_v59, %v687_v54 }
  0xf4   :  { %v699_v63 = vpop.eup %698  ;;  %v218_v0 = vpack.c.bf16 %v697_v61, %v689_v55  ;;  %v271_v5 = vsel %vm263_vm4, %v221_v60, 0 }
  0xf5   :  { %v701_v1 = vpop.eup %700  ;;  %273 = vmatprep.subr.bf16.mxu1 %v217_v62 }
  0xf6   :  { %v703_v2 = vpop.eup %702  ;;  %650 = vmatprep.subr.bf16.mxu0 %v218_v0  ;;  %274 = vmatpush1.bf16.msra.mxu1 %v216_v58 }
  0xf7   :  { %v705_v3 = vpop.eup %704  ;;  %651 = vmatpush3.bf16.msra.mxu0 %v218_v0  ;;  %v219_v4 = vpack.c.bf16 %v703_v2, %v699_v63 }
  0xf8   :  { %666 = vmatprep.subr.msk.bf16.mxu0 %vm263_vm4, %v221_v60  ;;  %v220_v6 = vpack.c.bf16 %v705_v3, %v701_v1 }
  0xf9   :  { %v265_v7 = vsel %vm263_vm4, %v219_v4, 0 }
  0xfa   :  { %614 = vmatprep.subr.msk.bf16.mxu1 %vm263_vm4, %v220_v6 }
  0xfb   :  { %653 = vmatpush3.bf16.msra.mxu0 %v271_v5  ;;  %276 = vmatpush1.bf16.msra.mxu1 %v265_v7 }
  0xfc   :  { %658 = vmatprep.subr.bf16.mxu1 %v780_v10 }
  0xfe   :  { %655 = vmatmul.mubr.msk.bf16.vlgmr.msra.gmra.mrb[8].mxu0 %vm256_vm3, %v681_v9  ;;  %615 = vmatmul.mubr.msk.bf16.vlgmr.msra.gmra.mrb[4].mxu1 %vm256_vm3, %v875_v23 }
  0xff   :  { %315 = vmatprep.mubr.bf16.mxu1 %v779_v8  ;;  %508 = vmatprep.mubr.bf16.mxu0 %v779_v8 }
 0x106   :  { %616 = vmatmul.mubr.msk.bf16.gmra.mrb[8].mxu1 %vm256_vm3, %v681_v9 }
 0x107   :  { %662 = vmatprep.mubr.msk.bf16.mxu1 %vm781_vm5, %v780_v10 }
 0x1d1   :  { %v656_v15 = vpop.f32.mrb[8].mxu0  ;;  %v307_v16 = vpop.f32.mrb[4].mxu1 }
 0x1d2   :  { %v369_v17 = vadd.f32 %v656_v15, %v239_v13  ;;  %v360_v18 = vpop.f32.mrb[9].mxu0  ;;  %v308_v19 = vadd.f32 %v307_v16, %v229_v11  ;;  %v309_v20 = vpop.f32.mrb[5].mxu1 }
 0x1d3   :  { %v361_v21 = vadd.f32 %v360_v18, %v229_v11  ;;  %v657_v8 = vpop.f32.mrb[10].mxu0  ;;  %v310_v22 = vadd.f32 %v309_v20, %v229_v11  ;;  %v311_v23 = vpop.f32.mrb[6].mxu1 }
 0x1d4   :  { %v627_v24 = vmul.f32 -1.442695, %v369_v17  ;;  %v372_v25 = vadd.f32 %v657_v8, %v244_v14  ;;  %v363_v26 = vpop.f32.mrb[11].mxu0  ;;  %v312_v27 = vadd.f32 %v311_v23, %v234_v12  ;;  %v313_v28 = vpop.f32.mrb[7].mxu1  ;;  %v619_v33 = vmul.f32 -1.442695, %v308_v19 }
 0x1d5   :  { %v621_v29 = vmul.f32 -1.442695, %v361_v21  ;;  %v364_v30 = vadd.f32 %v363_v26, %v234_v12  ;;  %v314_v31 = vadd.f32 %v313_v28, %v234_v12  ;;  %v620_v35 = vmul.f32 -1.442695, %v310_v22 }
 0x1d6   :  { %706 = vpow2.f32 %v627_v24  ;;  %v630_v32 = vmul.f32 -1.442695, %v372_v25  ;;  %v622_v36 = vmul.f32 -1.442695, %v312_v27  ;;  %v447_v27 = vld [vmem:[%s920_s5] sm:$0x1] }
 0x1d7   :  { %708 = vpow2.f32 %v621_v29  ;;  %v624_v34 = vmul.f32 -1.442695, %v364_v30  ;;  %v623_v37 = vmul.f32 -1.442695, %v314_v31  ;;  %v460_v31 = vlaneseq  ;;  %s783_s5 = smov [#allocation3]  }
 0x1d8   :  { %710 = vpow2.f32 %v630_v32  ;;  %s595_s27 = sshll.u32 %s783_s5, 4  ;;  %s596_s27 = int_to_ptr.vmem [resolvable:$true] %s595_s27 }
 0x1d9   :  { %712 = vpow2.f32 %v624_v34  ;;  %v317_v38 = vpop.f32.mrb[8].mxu1  ;;  %v461_v32 = vshrl.u32 %v460_v31, 7  ;;  %vm586_vm6 = vcmp.lt.s32.totalorder %v460_v31, 384  ;;  %s754_s28 = scalar_lea.vmem %s596_s27, 48  ;;  %s758_s29 = scalar_lea.vmem %s596_s27, 64 }
 0x1da   :  { %714 = vpow2.f32 %v619_v33  ;;  %v318_v39 = vadd.f32 %v317_v38, %v239_v13  ;;  %v319_v40 = vpop.f32.mrb[9].mxu1  ;;  %v782_v33 = vmov 1966171168   ;;  %p755_p0 = scmp.ne.s32.totalorder %s596_s27, %s754_s28  ;;  %p759_p1 = scmp.lt.s32.totalorder %s596_s27, %s596_s27 }
 0x1db   :  { %716 = vpow2.f32 %v620_v35  ;;  %v320_v41 = vadd.f32 %v319_v40, %v239_v13  ;;  %v321_v42 = vpop.f32.mrb[10].mxu1  ;;  %v562_v34 = vunpack.c.l.s4 %v782_v33  ;;  %v462_v35 = vsub.s32 0, %v461_v32  ;;  %p760_p2 = scmp.lt.s32.totalorder %s758_s29, %s754_s28 }
 0x1dc   :  { %718 = vpow2.f32 %v622_v36  ;;  %v625_v43 = vmul.f32 -1.442695, %v318_v39  ;;  %v322_v44 = vadd.f32 %v321_v42, %v244_v14  ;;  %v323_v45 = vpop.f32.mrb[11].mxu1 }
 0x1dd   :  { %720 = vpow2.f32 %v623_v37  ;;  %v626_v46 = vmul.f32 -1.442695, %v320_v41  ;;  %v324_v47 = vadd.f32 %v323_v45, %v244_v14  ;;  %v458_v37 = vpop.permute.xlu0 %457  ;;  %v563_v40 = vunpack.c.0.s8 %v562_v34  ;;  %p761_p3 = por %p760_p2, %p759_p1 }
 0x1de   :  { %722 = vpow2.f32 %v625_v43  ;;  %v628_v48 = vmul.f32 -1.442695, %v322_v44  ;;  %v463_v42 = vrot.slane %v458_v37, %v462_v35 }
 0x1df   :  { %724 = vpow2.f32 %v626_v46  ;;  %v629_v49 = vmul.f32 -1.442695, %v324_v47  ;;  %v566_v46 = vsub.s32 %v563_v40, %v461_v32  ;;  %p762_p4 = pnand %p761_p3, %p755_p0 }
 0x1e0   :  { %v707_v50 = vpop.eup %706  ;;  %726 = vpow2.f32 %v628_v48 }
 0x1e1   :  { %v709_v51 = vpop.eup %708  ;;  %v419_v52 = vadd.f32 1.0, %v707_v50  ;;  %728 = vpow2.f32 %v629_v49 }
 0x1e2   :  { %v711_v53 = vpop.eup %710  ;;  %v413_v54 = vadd.f32 1.0, %v709_v51 }
 0x1e3   :  { %v713_v55 = vpop.eup %712  ;;  %730 = vrcp.f32 %v419_v52  ;;  %v422_v56 = vadd.f32 1.0, %v711_v53 }
 0x1e4   :  { %v715_v57 = vpop.eup %714  ;;  %732 = vrcp.f32 %v413_v54  ;;  %v416_v58 = vadd.f32 1.0, %v713_v55 }
 0x1e5   :  { %v717_v59 = vpop.eup %716  ;;  %734 = vrcp.f32 %v422_v56  ;;  %v411_v60 = vadd.f32 1.0, %v715_v57 }
 0x1e6   :  { %v719_v61 = vpop.eup %718  ;;  %736 = vrcp.f32 %v416_v58  ;;  %v412_v62 = vadd.f32 1.0, %v717_v59 }
 0x1e7   :  { %v721_v63 = vpop.eup %720  ;;  %738 = vrcp.f32 %v411_v60  ;;  %v414_v0 = vadd.f32 1.0, %v719_v61 }
 0x1e8   :  { %v723_v1 = vpop.eup %722  ;;  %740 = vrcp.f32 %v412_v62  ;;  %v415_v2 = vadd.f32 1.0, %v721_v63 }
 0x1e9   :  { %v725_v3 = vpop.eup %724  ;;  %742 = vrcp.f32 %v414_v0  ;;  %v417_v4 = vadd.f32 1.0, %v723_v1 }
 0x1ea   :  { %v727_v5 = vpop.eup %726  ;;  %744 = vrcp.f32 %v415_v2  ;;  %v418_v6 = vadd.f32 1.0, %v725_v3 }
 0x1eb   :  { %v729_v7 = vpop.eup %728  ;;  %746 = vrcp.f32 %v417_v4  ;;  %v420_v9 = vadd.f32 1.0, %v727_v5 }
 0x1ec   :  { %748 = vrcp.f32 %v418_v6  ;;  %v421_v11 = vadd.f32 1.0, %v729_v7 }
 0x1ed   :  { %v731_v12 = vpop.eup %730  ;;  %750 = vrcp.f32 %v420_v9 }
 0x1ee   :  { %v733_v13 = vpop.eup %732  ;;  %752 = vrcp.f32 %v421_v11 }
 0x1ef   :  { %v735_v14 = vpop.eup %734 }
 0x1f0   :  { %v737_v15 = vpop.eup %736  ;;  %v453_v16 = vpack.c.bf16 %v735_v14, %v731_v12 }
 0x1f1   :  { %v739_v17 = vpop.eup %738  ;;  %v450_v18 = vpack.c.bf16 %v737_v15, %v733_v13 }
 0x1f2   :  { %v741_v19 = vpop.eup %740  ;;  %v474_v25 = vsel %vm263_vm4, %v453_v16, 0 }
 0x1f3   :  { %v743_v20 = vpop.eup %742  ;;  %659 = vmatpush3.bf16.msra.mxu1 %v450_v18 }
 0x1f4   :  { %v745_v21 = vpop.eup %744  ;;  %660 = vmatprep.subr.bf16.mxu1 %v780_v10  ;;  %v448_v8 = vpack.c.bf16 %v743_v20, %v739_v17 }
 0x1f5   :  { %v747_v22 = vpop.eup %746  ;;  %v449_v23 = vpack.c.bf16 %v745_v21, %v741_v19 }
 0x1f6   :  { %v749_v24 = vpop.eup %748 }
 0x1f7   :  { %v751_v26 = vpop.eup %750  ;;  %476 = vmatprep.subr.bf16.mxu0 %v449_v23  ;;  %661 = vmatpush3.bf16.msra.mxu1 %v474_v25 }
 0x1f8   :  { %v753_v28 = vpop.eup %752  ;;  %477 = vmatpush1.bf16.msra.mxu0 %v448_v8  ;;  %v451_v29 = vpack.c.bf16 %v751_v26, %v747_v22 }
 0x1f9   :  { %v452_v30 = vpack.c.bf16 %v753_v28, %v749_v24 }
 0x1fa   :  { %663 = vmatmul.mubr.msk.bf16.vlgmr.msra.gmra.mrb[12].mxu1 %vm256_vm3, %v447_v27  ;;  %v468_v10 = vsel %vm263_vm4, %v451_v29, 0 }
 0x1fb   :  { %631 = vmatprep.subr.msk.bf16.mxu0 %vm263_vm4, %v452_v30 }
 0x1fc   :  { %479 = vmatpush1.bf16.msra.mxu0 %v468_v10 }
 0x1ff   :  { %632 = vmatmul.mubr.msk.bf16.vlgmr.msra.gmra.mrb[12].mxu0 %vm256_vm3, %v447_v27 }
 0x2cd   :  { %v551_v36 = vpop.f32.mrb[12].mxu1 }
 0x2ce   :  { %v664_v38 = vpop.f32.mrb[13].mxu1  ;;  %v552_v47 = vadd.f32 %v551_v36, %v463_v42 }
 0x2cf   :  { %v554_v39 = vpop.f32.mrb[14].mxu1 }
 0x2d0   :  { %v665_v41 = vpop.f32.mrb[15].mxu1  ;;  %v574_v52 = vrot.slane %v552_v47, %v566_v46 }
 0x2d2   :  { %v510_v43 = vpop.f32.mrb[12].mxu0 }
 0x2d3   :  { %v511_v44 = vadd.f32 %v510_v43, %v463_v42  ;;  %v512_v45 = vpop.f32.mrb[13].mxu0 }
 0x2d4   :  { %v513_v48 = vadd.f32 %v512_v45, %v463_v42  ;;  %v514_v49 = vpop.f32.mrb[14].mxu0 }
 0x2d5   :  { %v515_v50 = vpop.f32.mrb[15].mxu0 }
 0x2d6   :  { %v560_v51 = vcombine.low %v511_v44, %v513_v48 }
 0x2d8   :  { %v567_v53 = vrot.slane %v560_v51, %v566_v46 }
 0x2da   :  { %v575_v54 = vcombine.low %v567_v53, %v574_v52 }
 0x2dc   :  { %v582_v55 = vrot.slane %v575_v54, %v566_v46 }
 0x2de   :  { %588 = vst.msk [vmem:[#allocation3] sm:$0x7] %vm586_vm6, %v582_v55 }
 0x2df   :  { %765 = shalt.err (!%p762_p4)
}
 0x2e0   :  { %s766_s8 = scalar_lea.hbm %s922_s7, 48 }
 0x2e1   :  { %p767_p5 = scmp.ne.s32.totalorder %s922_s7, %s766_s8  ;;  %p770_p6 = scmp.lt.u32.totalorder %s766_s8, %s922_s7 }
 0x2e3   :  { %p772_p7 = pnand %p770_p6, %p767_p5 }
 0x2e5   :  { %775 = shalt.err (!%p772_p7)
}
 0x2e6   :  { %598 = dma.vmem_to_hbm [thread:$0]  %s596_s27, 48, %s922_s7, [#allocation4]  }
 0x2e7   :  { %776 = dma.done.wait [#allocation4], 48  }
 0x2e8   :  { %777 = vsyncadd [#allocation4], 4294967248 }
 0x2e9   :  { %602 = vsyncpa [#allocation4], 1 }

</bundles_post_ra>
